<compile_context>
chip_gen: v7x
topology: tpu7x:2x2x1
jax: 0.10.0
libtpu: 0.0.40
codegen_flags: <defaults>
</compile_context>

<pallas_src>
import functools
import math

import jax
import jax.numpy as jnp
from jax.experimental import pallas as pl
from jax.experimental.pallas import tpu as pltpu


# ----------------------------------------------------------------------------
# Buffer setup -- same formula as the torch module.
# ----------------------------------------------------------------------------
def make_positional_encoding(max_len: int, d_model: int, dtype=jnp.float32):
    position = jnp.arange(max_len, dtype=jnp.float32)[:, None]            # (L, 1)
    div_term = jnp.exp(
        jnp.arange(0, d_model, 2, dtype=jnp.float32)
        * (-math.log(10000.0) / d_model)
    )                                                                      # (D/2,)
    pe = jnp.zeros((max_len, d_model), dtype=jnp.float32)
    pe = pe.at[:, 0::2].set(jnp.sin(position * div_term))
    pe = pe.at[:, 1::2].set(jnp.cos(position * div_term))
    return pe.astype(dtype)                                                # (L, D)


# ----------------------------------------------------------------------------
# Tiling helpers (per-generation VMEM / HBM budgets from the perf review).
# ----------------------------------------------------------------------------
def _target_block_bytes():
    try:
        kind = jax.devices()[0].device_kind.lower()
    except Exception:
        kind = ""
    if "v5 lite" in kind or "v5e" in kind:
        return 6 * 1024 * 1024          # 128 MiB VMEM, slow HBM -> big tiles
    if "v6" in kind:
        return 4 * 1024 * 1024
    return 2 * 1024 * 1024              # v7x (64 MiB physical VMEM) / unknown


def _pick_tile_s(S, row_bytes, target_bytes):
    cap = target_bytes // max(1, row_bytes)
    cap = max(min(S, 8), min(S, cap))   # at least 8 rows (or the whole sequence)
    best = None
    for t in range(cap, 0, -1):
        if S % t:
            continue
        if t % 8 == 0 or t == S:        # prefer sublane-aligned divisors
            return t
        if best is None:
            best = t
    return best if best is not None else S


# ----------------------------------------------------------------------------
# Kernels
# ----------------------------------------------------------------------------
def _pe_add_kernel(x_ref, pe_ref, o_ref):
    # Dense 2-D blocks (tile_s, B*D): plain lane-dense elementwise add.
    # TODO(synk): in a fused graph consider input_output_aliases={0: 0} or letting
    # XLA fuse this eval-mode add into neighbors instead of a standalone kernel.
    o_ref[...] = x_ref[...] + pe_ref[...]


def _as_i32(v):
    """Python int -> two's-complement int32 value."""
    return v - (1 << 32) if v >= (1 << 31) else v


def _shrl(x, n):
    # Logical right shift for int32: arithmetic shift, then mask the high bits.
    return (x >> n) & jnp.int32((1 << (32 - n)) - 1)


def _hash_i32(x):
    """lowbias32 mixing hash; int32 arithmetic wraps mod 2**32 (portable)."""
    x = (x ^ _shrl(x, 16)) * jnp.int32(_as_i32(0x7FEB352D))
    x = (x ^ _shrl(x, 15)) * jnp.int32(_as_i32(0x846CA68B))
    return x ^ _shrl(x, 16)


def _pe_add_dropout_kernel(seed_ref, x_ref, pe_ref, o_ref, *, threshold_i32, inv_keep):
    # TODO(synk): dropout matches torch only in distribution/scaling, not the RNG
    # bit-stream.
    tile_s, width = x_ref.shape
    y = x_ref[...] + pe_ref[...]

    # Stateless counter-based bits from the *global* element index, so the mask is
    # independent of tile_s and of the grid step.
    row = jax.lax.broadcasted_iota(jnp.int32, (tile_s, width), 0) \
        + pl.program_id(0) * tile_s
    col = jax.lax.broadcasted_iota(jnp.int32, (tile_s, width), 1)
    idx = row * jnp.int32(width) + col
    bits = _hash_i32(idx ^ (seed_ref[0] * jnp.int32(_as_i32(0x9E3779B9))))

    # Integer-domain threshold (perf review): uniform int32 bits, keep-prob = 1-p.
    keep = bits >= jnp.int32(threshold_i32)
    o_ref[...] = jnp.where(keep, y * inv_keep, jnp.zeros_like(y))


# ----------------------------------------------------------------------------
# Wrapper
# ----------------------------------------------------------------------------
def positional_encoding_fwd(x, pe, *, p=0.1, training=False, seed=0,
                            tile_s=None, block_bytes=None, interpret=False):
    """Pallas forward of PositionalEncoding: dropout(x + pe[:S]).

    x:  (S, B, D) array.   pe: (max_len, D) buffer from make_positional_encoding.
    """
    S, B, D = x.shape
    W = B * D

    # Lane-dense 2-D view; pe cast to x.dtype (avoids f32-promoted store into a
    # lower-precision output) and tiled across the batch in the wrapper.
    x2 = x.reshape(S, W)
    pe2 = jnp.tile(pe[:S].astype(x.dtype), (1, B))                 # (S, W)

    if block_bytes is None:
        block_bytes = _target_block_bytes()
    row_bytes = W * x.dtype.itemsize
    if tile_s is None:
        tile_s = _pick_tile_s(S, row_bytes, block_bytes)
    assert S % tile_s == 0, "tile_s must divide the sequence length"
    grid = (S // tile_s,)

    # TODO(synk): if profiling shows exposed DMA per step, bump x_spec with
    # pipeline_mode=pl.Buffered(3) — per-step compute here is near zero.
    x_spec = pl.BlockSpec((tile_s, W), lambda i, *_: (i, 0))
    pe_spec = pl.BlockSpec((tile_s, W), lambda i, *_: (i, 0))
    out_spec = pl.BlockSpec((tile_s, W), lambda i, *_: (i, 0))
    out_shape = jax.ShapeDtypeStruct((S, W), x.dtype)

    # ~3 block-resident arrays x 2 pipeline buffers + slack; sized so it stays
    # within v7x's 64 MiB physical VMEM for the conservative block target.
    block_b = tile_s * row_bytes
    vmem_limit = int(max(16 * 1024 * 1024, 8 * block_b))
    compiler_params = pltpu.CompilerParams(
        dimension_semantics=("parallel",),   # v7x: shard rows over its 2 TCs
        vmem_limit_bytes=vmem_limit,
    )

    if training and p > 0.0:
        thresh = int(round(float(p) * 4294967296.0)) - 2147483648
        thresh = max(-2147483648, min(2147483647, thresh))
        kernel = functools.partial(
            _pe_add_dropout_kernel,
            threshold_i32=thresh,
            inv_keep=float(1.0 / (1.0 - float(p))),
        )
        grid_spec = pltpu.PrefetchScalarGridSpec(
            num_scalar_prefetch=1, grid=grid,
            in_specs=[x_spec, pe_spec], out_specs=out_spec)
        seed_arr = jnp.asarray([seed], dtype=jnp.int32)
        y2 = pl.pallas_call(kernel, out_shape=out_shape, grid_spec=grid_spec,
                            compiler_params=compiler_params,
                            interpret=interpret)(seed_arr, x2, pe2)
    else:
        grid_spec = pltpu.PrefetchScalarGridSpec(
            num_scalar_prefetch=0, grid=grid,
            in_specs=[x_spec, pe_spec], out_specs=out_spec)
        y2 = pl.pallas_call(_pe_add_kernel, out_shape=out_shape, grid_spec=grid_spec,
                            compiler_params=compiler_params,
                            interpret=interpret)(x2, pe2)
    return y2.reshape(S, B, D)


# ----------------------------------------------------------------------------
# Demo / self-check
# ----------------------------------------------------------------------------
if __name__ == "__main__":
    S, B, D = 8, 2, 32          # seq=8, batch=2, d_model=32 (small demo shapes)
    MAX_LEN = 64                # small stand-in for the module default max_len=5000
    P_DROP = 0.1

    key = jax.random.PRNGKey(0)
    x = jax.random.normal(key, (S, B, D), dtype=jnp.float32)
    pe = make_positional_encoding(MAX_LEN, D)

    # Eval mode (dropout is identity): deterministic, check against reference.
    y_eval = jax.block_until_ready(
        positional_encoding_fwd(x, pe, p=P_DROP, training=False))
    ref = x + pe[:S][:, None, :]
    assert y_eval.shape == (S, B, D)
    assert jnp.allclose(y_eval, ref, atol=1e-6), "eval-mode mismatch"

    # Training mode: every element is either 0 (dropped) or ref/(1-p) (kept).
    y_train = jax.block_until_ready(
        positional_encoding_fwd(x, pe, p=P_DROP, training=True, seed=1234))
    scaled = ref / (1.0 - P_DROP)
    ok = jnp.isclose(y_train, scaled, atol=1e-5) | jnp.isclose(y_train, 0.0)
    assert bool(jnp.all(ok)), "training-mode dropout structure mismatch"

    print("KERNEL_OK")
</pallas_src>

<mosaic_0001>
module attributes {stable_mosaic.version = 11 : i64} {
  func.func @_pe_add_kernel(%arg0: i32, %arg1: memref<8x64xf32, #tpu.memory_space<vmem>>, %arg2: memref<8x64xf32, #tpu.memory_space<vmem>>, %arg3: memref<8x64xf32, #tpu.memory_space<vmem>>) attributes {dimension_semantics = [#tpu.dimension_semantics<parallel>], iteration_bounds = array<i64: 1>, scalar_prefetch = 0 : i64, scratch_operands = 0 : i64, tpu.core_type = #tpu.core_type<tc>, window_params = [{transform_indices = @transform_0, window_bounds = array<i64: 8, 64>}, {transform_indices = @transform_1, window_bounds = array<i64: 8, 64>}, {transform_indices = @transform_2, window_bounds = array<i64: 8, 64>}]} {
    %c0 = arith.constant 0 : index
    %c0_0 = arith.constant 0 : index
    %0 = vector.load %arg1[%c0, %c0_0] : memref<8x64xf32, #tpu.memory_space<vmem>>, vector<8x64xf32>
    %c0_1 = arith.constant 0 : index
    %c0_2 = arith.constant 0 : index
    %1 = vector.load %arg2[%c0_1, %c0_2] : memref<8x64xf32, #tpu.memory_space<vmem>>, vector<8x64xf32>
    %2 = arith.addf %0, %1 : vector<8x64xf32>
    %c0_3 = arith.constant 0 : index
    %c0_4 = arith.constant 0 : index
    %3 = vector.load %arg3[%c0_3, %c0_4] : memref<8x64xf32, #tpu.memory_space<vmem>>, vector<8x64xf32>
    tpu.vector_store %arg3[%c0_3, %c0_4], %2 {strides = array<i32>} : memref<8x64xf32, #tpu.memory_space<vmem>>, vector<8x64xf32>,
    return
  }
  func.func @transform_0(%arg0: i32) -> (i32, i32) {
    %c0_i32 = arith.constant 0 : i32
    %c0_i32_0 = arith.constant 0 : i32
    return %arg0, %c0_i32 : i32, i32
  }
  func.func @transform_1(%arg0: i32) -> (i32, i32) {
    %c0_i32 = arith.constant 0 : i32
    %c0_i32_0 = arith.constant 0 : i32
    return %arg0, %c0_i32 : i32, i32
  }
  func.func @transform_2(%arg0: i32) -> (i32, i32) {
    %c0_i32 = arith.constant 0 : i32
    %c0_i32_0 = arith.constant 0 : i32
    return %arg0, %c0_i32 : i32, i32
  }
}

</mosaic_0001>

<bundles_post_ra>
// kernel: tpu_custom_call.1
= control target key start
LH: loop header
LB: loop body
LE: loop exit
PB: predicated region body
PF: predicated region fallthrough
CT: control target
= control target key end

     0   :  { %7 = vsyncpa [#allocation3], 0  ;;  %s186_s0 = inlined_call_operand.hbm [shape: f32[8,64], index: 0, kind: input, shape index: {}]   ;;  %s187_s1 = inlined_call_operand.hbm [shape: f32[8,64], index: 1, kind: input, shape index: {}]   ;;  %s188_s2 = inlined_call_operand.hbm [shape: f32[8,64], index: 2, kind: output, shape index: {}]  }
   0x1   :  { %8 = vsyncpa [#allocation6], 0 }
   0x2   :  { %9 = vsyncpa [#allocation4], 0  ;;  %s132_s9 = smov [#allocation2]   ;;  %s133_s11 = smov [#allocation5]  }
   0x3   :  { %s16_s10 = sshll.u32 %s132_s9, 4  ;;  %s26_s12 = sshll.u32 %s133_s11, 4  ;;  %s17_s10 = int_to_ptr.vmem [resolvable:$true] %s16_s10  ;;  %s27_s12 = int_to_ptr.vmem [resolvable:$true] %s26_s12 }
   0x4   :  { %s60_s15 = scalar_lea.hbm %s186_s0, 128 }
   0x5   :  { %p61_p0 = scmp.ne.s32.totalorder %s186_s0, %s60_s15  ;;  %p64_p1 = scmp.lt.u32.totalorder %s60_s15, %s186_s0 }
   0x7   :  { %p66_p2 = pnand %p64_p1, %p61_p0 }
   0x9   :  { %69 = shalt.err (!%p66_p2)
}
   0xa   :  { %s70_s20 = scalar_lea.vmem %s17_s10, 128  ;;  %p75_p4 = scmp.lt.s32.totalorder %s17_s10, %s17_s10 }
   0xb   :  { %p71_p3 = scmp.ne.s32.totalorder %s17_s10, %s70_s20  ;;  %p76_p5 = scmp.lt.s32.totalorder %s70_s20, %s70_s20 }
   0xd   :  { %p77_p6 = por %p76_p5, %p75_p4 }
   0xf   :  { %p78_p7 = pnand %p77_p6, %p71_p3 }
  0x11   :  { %81 = shalt.err (!%p78_p7)
}
  0x12   :  { %19 = dma.hbm_to_vmem [thread:$0]  %s186_s0, 128, %s17_s10, [#allocation3]  }
  0x13   :  { %s82_s25 = scalar_lea.hbm %s187_s1, 128 }
  0x14   :  { %p83_p8 = scmp.ne.s32.totalorder %s187_s1, %s82_s25  ;;  %p86_p9 = scmp.lt.u32.totalorder %s82_s25, %s187_s1 }
  0x16   :  { %p88_p10 = pnand %p86_p9, %p83_p8 }
  0x18   :  { %91 = shalt.err (!%p88_p10)
}
  0x19   :  { %s92_s30 = scalar_lea.vmem %s27_s12, 128  ;;  %p97_p12 = scmp.lt.s32.totalorder %s27_s12, %s27_s12 }
  0x1a   :  { %p93_p11 = scmp.ne.s32.totalorder %s27_s12, %s92_s30  ;;  %p98_p13 = scmp.lt.s32.totalorder %s92_s30, %s92_s30 }
  0x1c   :  { %p99_p0 = por %p98_p13, %p97_p12 }
  0x1e   :  { %p100_p1 = pnand %p99_p0, %p93_p11 }
  0x20   :  { %103 = shalt.err (!%p100_p1)
}
  0x21   :  { %29 = dma.hbm_to_vmem [thread:$0]  %s187_s1, 128, %s27_s12, [#allocation6]  }
  0x22   :  { %126 = dma.done.wait [#allocation3], 128  }
  0x23   :  { %127 = vsyncadd [#allocation3], 4294967168 }
  0x24   :  { %128 = dma.done.wait [#allocation6], 128  }
  0x25   :  { %129 = vsyncadd [#allocation6], 4294967168  ;;  %s134_s4 = smov [#allocation7]   ;;  %v36_v0 = vld [vmem:[#allocation2] sm:$0xff]  ;;  %v37_v1 = vld [vmem:[#allocation5] sm:$0xff]  ;;  %vm39_vm0 = vcmask 523264  }
  0x26   :  { %s47_s5 = sshll.u32 %s134_s4, 4  ;;  %v38_v2 = vadd.f32 %v37_v1, %v36_v0  ;;  %s48_s5 = int_to_ptr.vmem [resolvable:$true] %s47_s5 }
  0x27   :  { %s104_s6 = scalar_lea.vmem %s48_s5, 128  ;;  %p109_p3 = scmp.lt.s32.totalorder %s48_s5, %s48_s5 }
  0x28   :  { %40 = vst.msk [vmem:[#allocation7] sm:$0xff] %vm39_vm0, %v38_v2  ;;  %p105_p2 = scmp.ne.s32.totalorder %s48_s5, %s104_s6  ;;  %p110_p4 = scmp.lt.s32.totalorder %s104_s6, %s104_s6 }
  0x2a   :  { %p111_p5 = por %p110_p4, %p109_p3 }
  0x2c   :  { %p112_p6 = pnand %p111_p5, %p105_p2 }
  0x2e   :  { %115 = shalt.err (!%p112_p6)
}
  0x2f   :  { %s116_s8 = scalar_lea.hbm %s188_s2, 128 }
  0x30   :  { %p117_p7 = scmp.ne.s32.totalorder %s188_s2, %s116_s8  ;;  %p120_p8 = scmp.lt.u32.totalorder %s116_s8, %s188_s2 }
  0x32   :  { %p122_p9 = pnand %p120_p8, %p117_p7 }
  0x34   :  { %125 = shalt.err (!%p122_p9)
}
  0x35   :  { %50 = dma.vmem_to_hbm [thread:$0]  %s48_s5, 128, %s188_s2, [#allocation4]  }
  0x36   :  { %130 = dma.done.wait [#allocation4], 128  }
  0x37   :  { %131 = vsyncadd [#allocation4], 4294967168 }
  0x38   :  { %54 = vsyncpa [#allocation3], 1 }
  0x39   :  { %55 = vsyncpa [#allocation6], 1 }
  0x3a   :  { %56 = vsyncpa [#allocation4], 1 }

</bundles_post_ra>
